<compile_context>
chip_gen: v5e
topology: v5e:2x2
jax: 0.10.0
libtpu: 0.0.40
codegen_flags: <defaults>
</compile_context>

<pallas_src>
import functools

import jax
import jax.numpy as jnp
from jax import lax
from jax.experimental import pallas as pl
from jax.experimental.pallas import tpu as pltpu

LEAKY_SLOPE = 0.01          # PyTorch nn.LeakyReLU default
_LANE = 128


def _round_up(x, m):
    return (x + m - 1) // m * m


def _vmem_limit_bytes():
    # v5e/v6e: 128 MiB physical VMEM (16/32 MiB scoped default); v7x: 64 MiB.
    # Use a generous fraction of what this chip actually has, capped at 96 MiB,
    # which lands at ~48 MiB on v7x (hard-ceiling headroom) and 96 MiB on v5e/v6e.
    try:
        cap = pltpu.get_tpu_info().vmem_capacity_bytes
    except Exception:  # pragma: no cover - conservative fallback
        cap = 64 * 1024 * 1024
    return int(min(cap * 3 // 4, 96 * 1024 * 1024))


# ------------------------------ fused kernel ---------------------------------

def _resblock_kernel(xt_ref, w1_ref, b1_ref, w2_ref, wsc_ref, b2_ref,
                     o_ref, h1_ref, *, stride, hp, ho, wo, slope):
    """One grid step = (one image, one Cout tile).

    xt_ref : (1, 3*Hp, Wo, Cin) bf16   width-gathered taps: xt[kw*Hp + h, c] = x_pad[h, kw + s*c]
    w1_ref : (9, Cin, C1P)      bf16   conv1 per-tap weights (full Cout, lane padded)
    b1_ref : (1, C1P)           f32
    w2_ref : (9, C1P, TN)       bf16   conv2 per-tap weights for this Cout tile
    wsc_ref: (Cin, TN)          bf16   1x1 shortcut (or identity) for this tile
    b2_ref : (1, TN)            f32    conv2 bias (+ shortcut bias) for this tile
    o_ref  : (1, Ho, Wo, TN)           output tile (lane dense)
    h1_ref : (Ho+2, Wo+2, C1P)  f32    VMEM scratch: LeakyReLU(conv1) with zero halo
    """
    co = pl.program_id(1)

    # ---- conv1 + LeakyReLU -> VMEM scratch (computed once per image) --------
    @pl.when(co == 0)
    def _conv1():
        h1_ref[...] = jnp.zeros_like(h1_ref)          # zero the halo ring
        c1p = h1_ref.shape[-1]

        def row_body(r, carry):
            acc = jnp.zeros((wo, c1p), jnp.float32)
            for kh in range(3):
                for kw in range(3):
                    lhs = xt_ref[0, kw * hp + stride * r + kh, :, :]   # (wo, cin)
                    acc = acc + jnp.dot(lhs, w1_ref[3 * kh + kw],
                                        preferred_element_type=jnp.float32)
            acc = acc + b1_ref[...]
            acc = jnp.where(acc >= 0, acc, slope * acc)
            h1_ref[r + 1, pl.ds(1, wo), :] = acc
            return carry

        lax.fori_loop(0, ho, row_body, 0)

    # ---- conv2 + shortcut/residual + bias + LeakyReLU for this Cout tile ----
    tn = o_ref.shape[-1]

    def row_body2(r, carry):
        acc = jnp.zeros((wo, tn), jnp.float32)
        for kh in range(3):
            for kw in range(3):
                lhs = h1_ref[r + kh, pl.ds(kw, wo), :].astype(w2_ref.dtype)
                acc = acc + jnp.dot(lhs, w2_ref[3 * kh + kw],
                                    preferred_element_type=jnp.float32)
        # 1x1 strided shortcut (downsample>1) or identity residual (wsc == I):
        # its input is the center tap row already resident in VMEM.
        xs = xt_ref[0, hp + stride * r + 1, :, :]                      # (wo, cin)
        acc = acc + jnp.dot(xs, wsc_ref[...], preferred_element_type=jnp.float32)
        acc = acc + b2_ref[...]
        acc = jnp.where(acc >= 0, acc, slope * acc)
        o_ref[0, r, :, :] = acc.astype(o_ref.dtype)
        return carry

    lax.fori_loop(0, ho, row_body2, 0)


# ------------------------------- JAX wrapper ----------------------------------

def resblock_forward(x_nchw, params, in_channels, out_channels,
                     compute_dtype=jnp.bfloat16, out_dtype=jnp.bfloat16):
    downsample = out_channels // in_channels
    s = max(downsample, 1)
    N, cin, H, W = x_nchw.shape
    assert cin == in_channels
    cout = out_channels
    if downsample <= 1:
        # The module's `out += x` (identity residual) only makes sense if
        # Cin == Cout; mirror that requirement explicitly.
        assert in_channels == out_channels, "identity residual needs Cin == Cout"

    Ho = (H - 1) // s + 1
    Wo = (W - 1) // s + 1
    Hp = H + 2

    c1p = _round_up(cout, _LANE)                 # lane-dense channel padding
    tn = 256 if (c1p % 256 == 0) else _LANE      # Cout tile (bounds resident w2)
    n_co = c1p // tn

    # NCHW -> NHWC, zero-pad the spatial halo ring once (single cheap XLA pass).
    x = jnp.transpose(x_nchw, (0, 2, 3, 1))
    xp = jnp.pad(x, ((0, 0), (1, 1), (1, 1), (0, 0)))
    # Width-direction tap gather at stride s (handles the conv1 stride without
    # strided in-kernel loads): xt[:, kw*Hp + h, c, :] == xp[:, h, kw + s*c, :].
    xt = jnp.concatenate(
        [xp[:, :, kw: kw + s * (Wo - 1) + 1: s, :] for kw in range(3)], axis=1
    ).astype(compute_dtype)                      # (N, 3*Hp, Wo, Cin)

    # Per-tap [Cin, Cout] weight matrices, zero-padded to the lane multiple.
    w1 = jnp.transpose(params["w1"], (2, 3, 1, 0)).reshape(9, cin, cout)
    w1 = jnp.pad(w1, ((0, 0), (0, 0), (0, c1p - cout))).astype(compute_dtype)
    b1 = jnp.pad(params["b1"].astype(jnp.float32), (0, c1p - cout)).reshape(1, c1p)

    w2 = jnp.transpose(params["w2"], (2, 3, 1, 0)).reshape(9, cout, cout)
    w2 = jnp.pad(w2, ((0, 0), (0, c1p - cout), (0, c1p - cout))).astype(compute_dtype)

    if downsample > 1:
        wsc = jnp.transpose(params["wsc"], (2, 3, 1, 0)).reshape(cin, cout)
        b2 = params["b2"].astype(jnp.float32) + params["bsc"].astype(jnp.float32)
    else:
        wsc = jnp.eye(cin, dtype=jnp.float32)    # identity residual as a 1x1 conv
        b2 = params["b2"].astype(jnp.float32)
    wsc = jnp.pad(wsc, ((0, 0), (0, c1p - cout))).astype(compute_dtype)
    b2 = jnp.pad(b2, (0, c1p - cout)).reshape(1, c1p)

    kernel = functools.partial(_resblock_kernel, stride=s, hp=Hp, ho=Ho, wo=Wo,
                               slope=LEAKY_SLOPE)

    out = pl.pallas_call(
        kernel,
        out_shape=jax.ShapeDtypeStruct((N, Ho, Wo, c1p), out_dtype),
        grid=(N, n_co),
        in_specs=[
            pl.BlockSpec((1, 3 * Hp, Wo, cin), lambda n, co: (n, 0, 0, 0)),
            pl.BlockSpec((9, cin, c1p), lambda n, co: (0, 0, 0)),
            pl.BlockSpec((1, c1p), lambda n, co: (0, 0)),
            pl.BlockSpec((9, c1p, tn), lambda n, co: (0, 0, co)),
            pl.BlockSpec((cin, tn), lambda n, co: (0, co)),
            pl.BlockSpec((1, tn), lambda n, co: (0, co)),
        ],
        out_specs=pl.BlockSpec((1, Ho, Wo, tn), lambda n, co: (n, 0, 0, co)),
        scratch_shapes=[pltpu.VMEM((Ho + 2, Wo + 2, c1p), jnp.float32)],
        compiler_params=pltpu.CompilerParams(
            dimension_semantics=("parallel", "arbitrary"),
            vmem_limit_bytes=_vmem_limit_bytes(),
        ),
    )(xt, w1, b1, w2, wsc, b2)

    # Module boundary: drop the lane padding, NHWC -> NCHW, back to input dtype.
    out = jnp.transpose(out[:, :, :, :cout], (0, 3, 1, 2))
    return out.astype(x_nchw.dtype)


# ---------------------------- reference (pure JAX) ----------------------------

def ref_forward(x, params, in_channels, out_channels):
    downsample = out_channels // in_channels
    s = max(downsample, 1)
    dn = ("NCHW", "OIHW", "NCHW")

    def conv(inp, w, b, stride, pad):
        y = lax.conv_general_dilated(inp, w, (stride, stride),
                                     ((pad, pad), (pad, pad)),
                                     dimension_numbers=dn)
        return y + b[None, :, None, None]

    def lrelu(v):
        return jnp.where(v >= 0, v, LEAKY_SLOPE * v)

    out = lrelu(conv(x, params["w1"], params["b1"], s, 1))
    out = conv(out, params["w2"], params["b2"], 1, 1)
    residual = x
    if downsample > 1:
        residual = conv(x, params["wsc"], params["bsc"], s, 0)
    return lrelu(out + residual)


# ---------------------------------- main ---------------------------------------

def _make_params(key, in_channels, out_channels):
    k = jax.random.split(key, 6)
    return {
        "w1": 0.1 * jax.random.normal(k[0], (out_channels, in_channels, 3, 3), jnp.float32),
        "b1": 0.1 * jax.random.normal(k[1], (out_channels,), jnp.float32),
        "w2": 0.1 * jax.random.normal(k[2], (out_channels, out_channels, 3, 3), jnp.float32),
        "b2": 0.1 * jax.random.normal(k[3], (out_channels,), jnp.float32),
        "wsc": 0.1 * jax.random.normal(k[4], (out_channels, in_channels, 1, 1), jnp.float32),
        "bsc": 0.1 * jax.random.normal(k[5], (out_channels,), jnp.float32),
    }


def _check(in_channels, out_channels, N, H, W, key):
    kp, kx = jax.random.split(key)
    params = _make_params(kp, in_channels, out_channels)
    x = jax.random.normal(kx, (N, in_channels, H, W), jnp.float32)

    out = jax.block_until_ready(resblock_forward(x, params, in_channels, out_channels))
    ref = jax.block_until_ready(ref_forward(x, params, in_channels, out_channels))

    s = max(out_channels // in_channels, 1)
    assert out.shape == ref.shape == (N, out_channels, H // s, W // s), (out.shape, ref.shape)
    # bf16 MXU operands / bf16 output store (f32 accumulation) vs f32 reference.
    err = float(jnp.max(jnp.abs(out - ref)))
    assert jnp.allclose(out, ref, atol=5e-2, rtol=5e-2), err


if __name__ == "__main__":
    key = jax.random.PRNGKey(0)
    k1, k2 = jax.random.split(key)

    # downsample = 2 branch (strided conv1 + fused 1x1 shortcut)
    _check(in_channels=4, out_channels=8, N=2, H=16, W=16, key=k1)
    # downsample = 1 branch (identity residual via wsc == I)
    _check(in_channels=8, out_channels=8, N=2, H=16, W=16, key=k2)

    print("KERNEL_OK")
</pallas_src>

<mosaic_0001>
module attributes {stable_mosaic.version = 11 : i64} {
  func.func @_resblock_kernel(%arg0: i32, %arg1: i32, %arg2: memref<1x54x8x4xbf16, #tpu.memory_space<vmem>>, %arg3: memref<9x4x128xbf16, #tpu.memory_space<vmem>>, %arg4: memref<1x128xf32, #tpu.memory_space<vmem>>, %arg5: memref<9x128x128xbf16, #tpu.memory_space<vmem>>, %arg6: memref<4x128xbf16, #tpu.memory_space<vmem>>, %arg7: memref<1x128xf32, #tpu.memory_space<vmem>>, %arg8: memref<1x8x8x128xbf16, #tpu.memory_space<vmem>>, %arg9: memref<10x10x128xf32, #tpu.memory_space<vmem>>) attributes {dimension_semantics = [#tpu.dimension_semantics<parallel>, #tpu.dimension_semantics<arbitrary>], iteration_bounds = array<i64: 2, 1>, scalar_prefetch = 0 : i64, scratch_operands = 1 : i64, tpu.core_type = #tpu.core_type<tc>, window_params = [{transform_indices = @transform_0, window_bounds = array<i64: 1, 54, 8, 4>}, {pipeline_mode = #tpu.pipeline_mode<synchronous>, transform_indices = @transform_1, window_bounds = array<i64: 9, 4, 128>}, {pipeline_mode = #tpu.pipeline_mode<synchronous>, transform_indices = @transform_2, window_bounds = array<i64: 1, 128>}, {transform_indices = @transform_3, window_bounds = array<i64: 9, 128, 128>}, {transform_indices = @transform_4, window_bounds = array<i64: 4, 128>}, {transform_indices = @transform_5, window_bounds = array<i64: 1, 128>}, {transform_indices = @transform_6, window_bounds = array<i64: 1, 8, 8, 128>}]} {
    %c0_i32 = arith.constant 0 : i32
    %0 = arith.cmpi eq, %arg1, %c0_i32 : i32
    %1 = arith.extui %0 : i1 to i32
    %c0_i32_0 = arith.constant 0 : i32
    %2 = arith.cmpi ne, %1, %c0_i32_0 : i32
    scf.if %2 {
      %cst = arith.constant 0.000000e+00 : f32
      %4 = vector.broadcast %cst : f32 to vector<10x10x128xf32>
      %c0 = arith.constant 0 : index
      %c0_3 = arith.constant 0 : index
      %c0_4 = arith.constant 0 : index
      %5 = vector.load %arg9[%c0, %c0_3, %c0_4] : memref<10x10x128xf32, #tpu.memory_space<vmem>>, vector<10x10x128xf32>
      tpu.vector_store %arg9[%c0, %c0_3, %c0_4], %4 {strides = array<i32>} : memref<10x10x128xf32, #tpu.memory_space<vmem>>, vector<10x10x128xf32>,
      %c0_i32_5 = arith.constant 0 : i32
      %c8_i32_6 = arith.constant 8 : i32
      %6 = arith.addi %c0_i32_5, %c8_i32_6 : i32
      %c1_i32_7 = arith.constant 1 : i32
      scf.for %arg10 = %c0_i32_5 to %6 step %c1_i32_7  : i32 {
        %cst_9 = arith.constant 0.000000e+00 : f32
        %7 = vector.broadcast %cst_9 : f32 to vector<8x128xf32>
        %c2_i32 = arith.constant 2 : i32
        %8 = arith.muli %c2_i32, %arg10 : i32
        %c0_i32_10 = arith.constant 0 : i32
        %9 = arith.addi %c0_i32_10, %8 : i32
        %c0_i32_11 = arith.constant 0 : i32
        %10 = arith.addi %9, %c0_i32_11 : i32
        %c0_12 = arith.constant 0 : index
        %11 = arith.index_cast %10 : i32 to index
        %c0_13 = arith.constant 0 : index
        %c0_14 = arith.constant 0 : index
        %12 = vector.load %arg2[%c0_12, %11, %c0_13, %c0_14] : memref<1x54x8x4xbf16, #tpu.memory_space<vmem>>, vector<1x1x8x4xbf16>
        %13 = vector.shape_cast %12 : vector<1x1x8x4xbf16> to vector<8x4xbf16>
        %c0_15 = arith.constant 0 : index
        %c0_16 = arith.constant 0 : index
        %c0_17 = arith.constant 0 : index
        %14 = vector.load %arg3[%c0_15, %c0_16, %c0_17] : memref<9x4x128xbf16, #tpu.memory_space<vmem>>, vector<1x4x128xbf16>
        %15 = vector.shape_cast %14 : vector<1x4x128xbf16> to vector<4x128xbf16>
        %cst_18 = arith.constant dense<0.000000e+00> : vector<8x128xf32>
        %16 = tpu.matmul %13, %15, %cst_18 {dimension_numbers = #tpu.dot_dimension_numbers<[1], [0], [0], [1], [0, 0, 1, 1], [], []>} : vector<8x4xbf16>, vector<4x128xbf16>, vector<8x128xf32> -> vector<8x128xf32>
        %17 = arith.addf %7, %16 : vector<8x128xf32>
        %c2_i32_19 = arith.constant 2 : i32
        %18 = arith.muli %c2_i32_19, %arg10 : i32
        %c18_i32 = arith.constant 18 : i32
        %19 = arith.addi %c18_i32, %18 : i32
        %c0_i32_20 = arith.constant 0 : i32
        %20 = arith.addi %19, %c0_i32_20 : i32
        %c0_21 = arith.constant 0 : index
        %21 = arith.index_cast %20 : i32 to index
        %c0_22 = arith.constant 0 : index
        %c0_23 = arith.constant 0 : index
        %22 = vector.load %arg2[%c0_21, %21, %c0_22, %c0_23] : memref<1x54x8x4xbf16, #tpu.memory_space<vmem>>, vector<1x1x8x4xbf16>
        %23 = vector.shape_cast %22 : vector<1x1x8x4xbf16> to vector<8x4xbf16>
        %c1 = arith.constant 1 : index
        %c0_24 = arith.constant 0 : index
        %c0_25 = arith.constant 0 : index
        %24 = vector.load %arg3[%c1, %c0_24, %c0_25] : memref<9x4x128xbf16, #tpu.memory_space<vmem>>, vector<1x4x128xbf16>
        %25 = vector.shape_cast %24 : vector<1x4x128xbf16> to vector<4x128xbf16>
        %cst_26 = arith.constant dense<0.000000e+00> : vector<8x128xf32>
        %26 = tpu.matmul %23, %25, %cst_26 {dimension_numbers = #tpu.dot_dimension_numbers<[1], [0], [0], [1], [0, 0, 1, 1], [], []>} : vector<8x4xbf16>, vector<4x128xbf16>, vector<8x128xf32> -> vector<8x128xf32>
        %27 = arith.addf %17, %26 : vector<8x128xf32>
        %c2_i32_27 = arith.constant 2 : i32
        %28 = arith.muli %c2_i32_27, %arg10 : i32
        %c36_i32 = arith.constant 36 : i32
        %29 = arith.addi %c36_i32, %28 : i32
        %c0_i32_28 = arith.constant 0 : i32
        %30 = arith.addi %29, %c0_i32_28 : i32
        %c0_29 = arith.constant 0 : index
        %31 = arith.index_cast %30 : i32 to index
        %c0_30 = arith.constant 0 : index
        %c0_31 = arith.constant 0 : index
        %32 = vector.load %arg2[%c0_29, %31, %c0_30, %c0_31] : memref<1x54x8x4xbf16, #tpu.memory_space<vmem>>, vector<1x1x8x4xbf16>
        %33 = vector.shape_cast %32 : vector<1x1x8x4xbf16> to vector<8x4xbf16>
        %c2 = arith.constant 2 : index
        %c0_32 = arith.constant 0 : index
        %c0_33 = arith.constant 0 : index
        %34 = vector.load %arg3[%c2, %c0_32, %c0_33] : memref<9x4x128xbf16, #tpu.memory_space<vmem>>, vector<1x4x128xbf16>
        %35 = vector.shape_cast %34 : vector<1x4x128xbf16> to vector<4x128xbf16>
        %cst_34 = arith.constant dense<0.000000e+00> : vector<8x128xf32>
        %36 = tpu.matmul %33, %35, %cst_34 {dimension_numbers = #tpu.dot_dimension_numbers<[1], [0], [0], [1], [0, 0, 1, 1], [], []>} : vector<8x4xbf16>, vector<4x128xbf16>, vector<8x128xf32> -> vector<8x128xf32>
        %37 = arith.addf %27, %36 : vector<8x128xf32>
        %c2_i32_35 = arith.constant 2 : i32
        %38 = arith.muli %c2_i32_35, %arg10 : i32
        %c0_i32_36 = arith.constant 0 : i32
        %39 = arith.addi %c0_i32_36, %38 : i32
        %c1_i32_37 = arith.constant 1 : i32
        %40 = arith.addi %39, %c1_i32_37 : i32
        %c0_38 = arith.constant 0 : index
        %41 = arith.index_cast %40 : i32 to index
        %c0_39 = arith.constant 0 : index
        %c0_40 = arith.constant 0 : index
        %42 = vector.load %arg2[%c0_38, %41, %c0_39, %c0_40] : memref<1x54x8x4xbf16, #tpu.memory_space<vmem>>, vector<1x1x8x4xbf16>
        %43 = vector.shape_cast %42 : vector<1x1x8x4xbf16> to vector<8x4xbf16>
        %c3 = arith.constant 3 : index
        %c0_41 = arith.constant 0 : index
        %c0_42 = arith.constant 0 : index
        %44 = vector.load %arg3[%c3, %c0_41, %c0_42] : memref<9x4x128xbf16, #tpu.memory_space<vmem>>, vector<1x4x128xbf16>
        %45 = vector.shape_cast %44 : vector<1x4x128xbf16> to vector<4x128xbf16>
        %cst_43 = arith.constant dense<0.000000e+00> : vector<8x128xf32>
        %46 = tpu.matmul %43, %45, %cst_43 {dimension_numbers = #tpu.dot_dimension_numbers<[1], [0], [0], [1], [0, 0, 1, 1], [], []>} : vector<8x4xbf16>, vector<4x128xbf16>, vector<8x128xf32> -> vector<8x128xf32>
        %47 = arith.addf %37, %46 : vector<8x128xf32>
        %c2_i32_44 = arith.constant 2 : i32
        %48 = arith.muli %c2_i32_44, %arg10 : i32
        %c18_i32_45 = arith.constant 18 : i32
        %49 = arith.addi %c18_i32_45, %48 : i32
        %c1_i32_46 = arith.constant 1 : i32
        %50 = arith.addi %49, %c1_i32_46 : i32
        %c0_47 = arith.constant 0 : index
        %51 = arith.index_cast %50 : i32 to index
        %c0_48 = arith.constant 0 : index
        %c0_49 = arith.constant 0 : index
        %52 = vector.load %arg2[%c0_47, %51, %c0_48, %c0_49] : memref<1x54x8x4xbf16, #tpu.memory_space<vmem>>, vector<1x1x8x4xbf16>
        %53 = vector.shape_cast %52 : vector<1x1x8x4xbf16> to vector<8x4xbf16>
        %c4 = arith.constant 4 : index
        %c0_50 = arith.constant 0 : index
        %c0_51 = arith.constant 0 : index
        %54 = vector.load %arg3[%c4, %c0_50, %c0_51] : memref<9x4x128xbf16, #tpu.memory_space<vmem>>, vector<1x4x128xbf16>
        %55 = vector.shape_cast %54 : vector<1x4x128xbf16> to vector<4x128xbf16>
        %cst_52 = arith.constant dense<0.000000e+00> : vector<8x128xf32>
        %56 = tpu.matmul %53, %55, %cst_52 {dimension_numbers = #tpu.dot_dimension_numbers<[1], [0], [0], [1], [0, 0, 1, 1], [], []>} : vector<8x4xbf16>, vector<4x128xbf16>, vector<8x128xf32> -> vector<8x128xf32>
        %57 = arith.addf %47, %56 : vector<8x128xf32>
        %c2_i32_53 = arith.constant 2 : i32
        %58 = arith.muli %c2_i32_53, %arg10 : i32
        %c36_i32_54 = arith.constant 36 : i32
        %59 = arith.addi %c36_i32_54, %58 : i32
        %c1_i32_55 = arith.constant 1 : i32
        %60 = arith.addi %59, %c1_i32_55 : i32
        %c0_56 = arith.constant 0 : index
        %61 = arith.index_cast %60 : i32 to index
        %c0_57 = arith.constant 0 : index
        %c0_58 = arith.constant 0 : index
        %62 = vector.load %arg2[%c0_56, %61, %c0_57, %c0_58] : memref<1x54x8x4xbf16, #tpu.memory_space<vmem>>, vector<1x1x8x4xbf16>
        %63 = vector.shape_cast %62 : vector<1x1x8x4xbf16> to vector<8x4xbf16>
        %c5 = arith.constant 5 : index
        %c0_59 = arith.constant 0 : index
        %c0_60 = arith.constant 0 : index
        %64 = vector.load %arg3[%c5, %c0_59, %c0_60] : memref<9x4x128xbf16, #tpu.memory_space<vmem>>, vector<1x4x128xbf16>
        %65 = vector.shape_cast %64 : vector<1x4x128xbf16> to vector<4x128xbf16>
        %cst_61 = arith.constant dense<0.000000e+00> : vector<8x128xf32>
        %66 = tpu.matmul %63, %65, %cst_61 {dimension_numbers = #tpu.dot_dimension_numbers<[1], [0], [0], [1], [0, 0, 1, 1], [], []>} : vector<8x4xbf16>, vector<4x128xbf16>, vector<8x128xf32> -> vector<8x128xf32>
        %67 = arith.addf %57, %66 : vector<8x128xf32>
        %c2_i32_62 = arith.constant 2 : i32
        %68 = arith.muli %c2_i32_62, %arg10 : i32
        %c0_i32_63 = arith.constant 0 : i32
        %69 = arith.addi %c0_i32_63, %68 : i32
        %c2_i32_64 = arith.constant 2 : i32
        %70 = arith.addi %69, %c2_i32_64 : i32
        %c0_65 = arith.constant 0 : index
        %71 = arith.index_cast %70 : i32 to index
        %c0_66 = arith.constant 0 : index
        %c0_67 = arith.constant 0 : index
        %72 = vector.load %arg2[%c0_65, %71, %c0_66, %c0_67] : memref<1x54x8x4xbf16, #tpu.memory_space<vmem>>, vector<1x1x8x4xbf16>
        %73 = vector.shape_cast %72 : vector<1x1x8x4xbf16> to vector<8x4xbf16>
        %c6 = arith.constant 6 : index
        %c0_68 = arith.constant 0 : index
        %c0_69 = arith.constant 0 : index
        %74 = vector.load %arg3[%c6, %c0_68, %c0_69] : memref<9x4x128xbf16, #tpu.memory_space<vmem>>, vector<1x4x128xbf16>
        %75 = vector.shape_cast %74 : vector<1x4x128xbf16> to vector<4x128xbf16>
        %cst_70 = arith.constant dense<0.000000e+00> : vector<8x128xf32>
        %76 = tpu.matmul %73, %75, %cst_70 {dimension_numbers = #tpu.dot_dimension_numbers<[1], [0], [0], [1], [0, 0, 1, 1], [], []>} : vector<8x4xbf16>, vector<4x128xbf16>, vector<8x128xf32> -> vector<8x128xf32>
        %77 = arith.addf %67, %76 : vector<8x128xf32>
        %c2_i32_71 = arith.constant 2 : i32
        %78 = arith.muli %c2_i32_71, %arg10 : i32
        %c18_i32_72 = arith.constant 18 : i32
        %79 = arith.addi %c18_i32_72, %78 : i32
        %c2_i32_73 = arith.constant 2 : i32
        %80 = arith.addi %79, %c2_i32_73 : i32
        %c0_74 = arith.constant 0 : index
        %81 = arith.index_cast %80 : i32 to index
        %c0_75 = arith.constant 0 : index
        %c0_76 = arith.constant 0 : index
        %82 = vector.load %arg2[%c0_74, %81, %c0_75, %c0_76] : memref<1x54x8x4xbf16, #tpu.memory_space<vmem>>, vector<1x1x8x4xbf16>
        %83 = vector.shape_cast %82 : vector<1x1x8x4xbf16> to vector<8x4xbf16>
        %c7 = arith.constant 7 : index
        %c0_77 = arith.constant 0 : index
        %c0_78 = arith.constant 0 : index
        %84 = vector.load %arg3[%c7, %c0_77, %c0_78] : memref<9x4x128xbf16, #tpu.memory_space<vmem>>, vector<1x4x128xbf16>
        %85 = vector.shape_cast %84 : vector<1x4x128xbf16> to vector<4x128xbf16>
        %cst_79 = arith.constant dense<0.000000e+00> : vector<8x128xf32>
        %86 = tpu.matmul %83, %85, %cst_79 {dimension_numbers = #tpu.dot_dimension_numbers<[1], [0], [0], [1], [0, 0, 1, 1], [], []>} : vector<8x4xbf16>, vector<4x128xbf16>, vector<8x128xf32> -> vector<8x128xf32>
        %87 = arith.addf %77, %86 : vector<8x128xf32>
        %c2_i32_80 = arith.constant 2 : i32
        %88 = arith.muli %c2_i32_80, %arg10 : i32
        %c36_i32_81 = arith.constant 36 : i32
        %89 = arith.addi %c36_i32_81, %88 : i32
        %c2_i32_82 = arith.constant 2 : i32
        %90 = arith.addi %89, %c2_i32_82 : i32
        %c0_83 = arith.constant 0 : index
        %91 = arith.index_cast %90 : i32 to index
        %c0_84 = arith.constant 0 : index
        %c0_85 = arith.constant 0 : index
        %92 = vector.load %arg2[%c0_83, %91, %c0_84, %c0_85] : memref<1x54x8x4xbf16, #tpu.memory_space<vmem>>, vector<1x1x8x4xbf16>
        %93 = vector.shape_cast %92 : vector<1x1x8x4xbf16> to vector<8x4xbf16>
        %c8 = arith.constant 8 : index
        %c0_86 = arith.constant 0 : index
        %c0_87 = arith.constant 0 : index
        %94 = vector.load %arg3[%c8, %c0_86, %c0_87] : memref<9x4x128xbf16, #tpu.memory_space<vmem>>, vector<1x4x128xbf16>
        %95 = vector.shape_cast %94 : vector<1x4x128xbf16> to vector<4x128xbf16>
        %cst_88 = arith.constant dense<0.000000e+00> : vector<8x128xf32>
        %96 = tpu.matmul %93, %95, %cst_88 {dimension_numbers = #tpu.dot_dimension_numbers<[1], [0], [0], [1], [0, 0, 1, 1], [], []>} : vector<8x4xbf16>, vector<4x128xbf16>, vector<8x128xf32> -> vector<8x128xf32>
        %97 = arith.addf %87, %96 : vector<8x128xf32>
        %c0_89 = arith.constant 0 : index
        %c0_90 = arith.constant 0 : index
        %98 = vector.load %arg4[%c0_89, %c0_90] : memref<1x128xf32, #tpu.memory_space<vmem>>, vector<1x128xf32>
        %99 = vector.broadcast %98 : vector<1x128xf32> to vector<8x128xf32>
        %100 = arith.addf %97, %99 : vector<8x128xf32>
        %cst_91 = arith.constant 0.000000e+00 : f32
        %101 = vector.broadcast %cst_91 : f32 to vector<8x128xf32>
        %102 = arith.cmpf oge, %100, %101 : vector<8x128xf32>
        %cst_92 = arith.constant 0.00999999977 : f32
        %103 = vector.broadcast %cst_92 : f32 to vector<8x128xf32>
        %104 = arith.mulf %103, %100 : vector<8x128xf32>
        %105 = arith.select %102, %100, %104 : vector<8x128xi1>, vector<8x128xf32>
        %c1_i32_93 = arith.constant 1 : i32
        %106 = arith.addi %arg10, %c1_i32_93 : i32
        %107 = arith.index_cast %106 : i32 to index
        %c1_94 = arith.constant 1 : index
        %c0_95 = arith.constant 0 : index
        %108 = vector.load %arg9[%107, %c1_94, %c0_95] : memref<10x10x128xf32, #tpu.memory_space<vmem>>, vector<1x8x128xf32>
        %109 = vector.shape_cast %108 : vector<1x8x128xf32> to vector<8x128xf32>
        %110 = vector.shape_cast %105 : vector<8x128xf32> to vector<1x8x128xf32>
        tpu.vector_store %arg9[%107, %c1_94, %c0_95], %110 {strides = array<i32>} : memref<10x10x128xf32, #tpu.memory_space<vmem>>, vector<1x8x128xf32>,
      }
      %c8_i32_8 = arith.constant 8 : i32
    } else {
    }
    %c0_i32_1 = arith.constant 0 : i32
    %c8_i32 = arith.constant 8 : i32
    %3 = arith.addi %c0_i32_1, %c8_i32 : i32
    %c1_i32 = arith.constant 1 : i32
    scf.for %arg10 = %c0_i32_1 to %3 step %c1_i32  : i32 {
      %cst = arith.constant 0.000000e+00 : f32
      %4 = vector.broadcast %cst : f32 to vector<8x128xf32>
      %c0_i32_3 = arith.constant 0 : i32
      %5 = arith.addi %arg10, %c0_i32_3 : i32
      %6 = arith.index_cast %5 : i32 to index
      %c0 = arith.constant 0 : index
      %c0_4 = arith.constant 0 : index
      %7 = vector.load %arg9[%6, %c0, %c0_4] : memref<10x10x128xf32, #tpu.memory_space<vmem>>, vector<1x8x128xf32>
      %8 = vector.shape_cast %7 : vector<1x8x128xf32> to vector<8x128xf32>
      %9 = arith.truncf %8 : vector<8x128xf32> to vector<8x128xbf16>
      %c0_5 = arith.constant 0 : index
      %c0_6 = arith.constant 0 : index
      %c0_7 = arith.constant 0 : index
      %10 = vector.load %arg5[%c0_5, %c0_6, %c0_7] : memref<9x128x128xbf16, #tpu.memory_space<vmem>>, vector<1x128x128xbf16>
      %11 = vector.shape_cast %10 : vector<1x128x128xbf16> to vector<128x128xbf16>
      %cst_8 = arith.constant dense<0.000000e+00> : vector<8x128xf32>
      %12 = tpu.matmul %9, %11, %cst_8 {dimension_numbers = #tpu.dot_dimension_numbers<[1], [0], [0], [1], [0, 0, 1, 1], [], []>} : vector<8x128xbf16>, vector<128x128xbf16>, vector<8x128xf32> -> vector<8x128xf32>
      %13 = arith.addf %4, %12 : vector<8x128xf32>
      %c0_i32_9 = arith.constant 0 : i32
      %14 = arith.addi %arg10, %c0_i32_9 : i32
      %15 = arith.index_cast %14 : i32 to index
      %c1 = arith.constant 1 : index
      %c0_10 = arith.constant 0 : index
      %16 = vector.load %arg9[%15, %c1, %c0_10] : memref<10x10x128xf32, #tpu.memory_space<vmem>>, vector<1x8x128xf32>
      %17 = vector.shape_cast %16 : vector<1x8x128xf32> to vector<8x128xf32>
      %18 = arith.truncf %17 : vector<8x128xf32> to vector<8x128xbf16>
      %c1_11 = arith.constant 1 : index
      %c0_12 = arith.constant 0 : index
      %c0_13 = arith.constant 0 : index
      %19 = vector.load %arg5[%c1_11, %c0_12, %c0_13] : memref<9x128x128xbf16, #tpu.memory_space<vmem>>, vector<1x128x128xbf16>
      %20 = vector.shape_cast %19 : vector<1x128x128xbf16> to vector<128x128xbf16>
      %cst_14 = arith.constant dense<0.000000e+00> : vector<8x128xf32>
      %21 = tpu.matmul %18, %20, %cst_14 {dimension_numbers = #tpu.dot_dimension_numbers<[1], [0], [0], [1], [0, 0, 1, 1], [], []>} : vector<8x128xbf16>, vector<128x128xbf16>, vector<8x128xf32> -> vector<8x128xf32>
      %22 = arith.addf %13, %21 : vector<8x128xf32>
      %c0_i32_15 = arith.constant 0 : i32
      %23 = arith.addi %arg10, %c0_i32_15 : i32
      %24 = arith.index_cast %23 : i32 to index
      %c2 = arith.constant 2 : index
      %c0_16 = arith.constant 0 : index
      %25 = vector.load %arg9[%24, %c2, %c0_16] : memref<10x10x128xf32, #tpu.memory_space<vmem>>, vector<1x8x128xf32>
      %26 = vector.shape_cast %25 : vector<1x8x128xf32> to vector<8x128xf32>
      %27 = arith.truncf %26 : vector<8x128xf32> to vector<8x128xbf16>
      %c2_17 = arith.constant 2 : index
      %c0_18 = arith.constant 0 : index
      %c0_19 = arith.constant 0 : index
      %28 = vector.load %arg5[%c2_17, %c0_18, %c0_19] : memref<9x128x128xbf16, #tpu.memory_space<vmem>>, vector<1x128x128xbf16>
      %29 = vector.shape_cast %28 : vector<1x128x128xbf16> to vector<128x128xbf16>
      %cst_20 = arith.constant dense<0.000000e+00> : vector<8x128xf32>
      %30 = tpu.matmul %27, %29, %cst_20 {dimension_numbers = #tpu.dot_dimension_numbers<[1], [0], [0], [1], [0, 0, 1, 1], [], []>} : vector<8x128xbf16>, vector<128x128xbf16>, vector<8x128xf32> -> vector<8x128xf32>
      %31 = arith.addf %22, %30 : vector<8x128xf32>
      %c1_i32_21 = arith.constant 1 : i32
      %32 = arith.addi %arg10, %c1_i32_21 : i32
      %33 = arith.index_cast %32 : i32 to index
      %c0_22 = arith.constant 0 : index
      %c0_23 = arith.constant 0 : index
      %34 = vector.load %arg9[%33, %c0_22, %c0_23] : memref<10x10x128xf32, #tpu.memory_space<vmem>>, vector<1x8x128xf32>
      %35 = vector.shape_cast %34 : vector<1x8x128xf32> to vector<8x128xf32>
      %36 = arith.truncf %35 : vector<8x128xf32> to vector<8x128xbf16>
      %c3 = arith.constant 3 : index
      %c0_24 = arith.constant 0 : index
      %c0_25 = arith.constant 0 : index
      %37 = vector.load %arg5[%c3, %c0_24, %c0_25] : memref<9x128x128xbf16, #tpu.memory_space<vmem>>, vector<1x128x128xbf16>
      %38 = vector.shape_cast %37 : vector<1x128x128xbf16> to vector<128x128xbf16>
      %cst_26 = arith.constant dense<0.000000e+00> : vector<8x128xf32>
      %39 = tpu.matmul %36, %38, %cst_26 {dimension_numbers = #tpu.dot_dimension_numbers<[1], [0], [0], [1], [0, 0, 1, 1], [], []>} : vector<8x128xbf16>, vector<128x128xbf16>, vector<8x128xf32> -> vector<8x128xf32>
      %40 = arith.addf %31, %39 : vector<8x128xf32>
      %c1_i32_27 = arith.constant 1 : i32
      %41 = arith.addi %arg10, %c1_i32_27 : i32
      %42 = arith.index_cast %41 : i32 to index
      %c1_28 = arith.constant 1 : index
      %c0_29 = arith.constant 0 : index
      %43 = vector.load %arg9[%42, %c1_28, %c0_29] : memref<10x10x128xf32, #tpu.memory_space<vmem>>, vector<1x8x128xf32>
      %44 = vector.shape_cast %43 : vector<1x8x128xf32> to vector<8x128xf32>
      %45 = arith.truncf %44 : vector<8x128xf32> to vector<8x128xbf16>
      %c4 = arith.constant 4 : index
      %c0_30 = arith.constant 0 : index
      %c0_31 = arith.constant 0 : index
      %46 = vector.load %arg5[%c4, %c0_30, %c0_31] : memref<9x128x128xbf16, #tpu.memory_space<vmem>>, vector<1x128x128xbf16>
      %47 = vector.shape_cast %46 : vector<1x128x128xbf16> to vector<128x128xbf16>
      %cst_32 = arith.constant dense<0.000000e+00> : vector<8x128xf32>
      %48 = tpu.matmul %45, %47, %cst_32 {dimension_numbers = #tpu.dot_dimension_numbers<[1], [0], [0], [1], [0, 0, 1, 1], [], []>} : vector<8x128xbf16>, vector<128x128xbf16>, vector<8x128xf32> -> vector<8x128xf32>
      %49 = arith.addf %40, %48 : vector<8x128xf32>
      %c1_i32_33 = arith.constant 1 : i32
      %50 = arith.addi %arg10, %c1_i32_33 : i32
      %51 = arith.index_cast %50 : i32 to index
      %c2_34 = arith.constant 2 : index
      %c0_35 = arith.constant 0 : index
      %52 = vector.load %arg9[%51, %c2_34, %c0_35] : memref<10x10x128xf32, #tpu.memory_space<vmem>>, vector<1x8x128xf32>
      %53 = vector.shape_cast %52 : vector<1x8x128xf32> to vector<8x128xf32>
      %54 = arith.truncf %53 : vector<8x128xf32> to vector<8x128xbf16>
      %c5 = arith.constant 5 : index
      %c0_36 = arith.constant 0 : index
      %c0_37 = arith.constant 0 : index
      %55 = vector.load %arg5[%c5, %c0_36, %c0_37] : memref<9x128x128xbf16, #tpu.memory_space<vmem>>, vector<1x128x128xbf16>
      %56 = vector.shape_cast %55 : vector<1x128x128xbf16> to vector<128x128xbf16>
      %cst_38 = arith.constant dense<0.000000e+00> : vector<8x128xf32>
      %57 = tpu.matmul %54, %56, %cst_38 {dimension_numbers = #tpu.dot_dimension_numbers<[1], [0], [0], [1], [0, 0, 1, 1], [], []>} : vector<8x128xbf16>, vector<128x128xbf16>, vector<8x128xf32> -> vector<8x128xf32>
      %58 = arith.addf %49, %57 : vector<8x128xf32>
      %c2_i32 = arith.constant 2 : i32
      %59 = arith.addi %arg10, %c2_i32 : i32
      %60 = arith.index_cast %59 : i32 to index
      %c0_39 = arith.constant 0 : index
      %c0_40 = arith.constant 0 : index
      %61 = vector.load %arg9[%60, %c0_39, %c0_40] : memref<10x10x128xf32, #tpu.memory_space<vmem>>, vector<1x8x128xf32>
      %62 = vector.shape_cast %61 : vector<1x8x128xf32> to vector<8x128xf32>
      %63 = arith.truncf %62 : vector<8x128xf32> to vector<8x128xbf16>
      %c6 = arith.constant 6 : index
      %c0_41 = arith.constant 0 : index
      %c0_42 = arith.constant 0 : index
      %64 = vector.load %arg5[%c6, %c0_41, %c0_42] : memref<9x128x128xbf16, #tpu.memory_space<vmem>>, vector<1x128x128xbf16>
      %65 = vector.shape_cast %64 : vector<1x128x128xbf16> to vector<128x128xbf16>
      %cst_43 = arith.constant dense<0.000000e+00> : vector<8x128xf32>
      %66 = tpu.matmul %63, %65, %cst_43 {dimension_numbers = #tpu.dot_dimension_numbers<[1], [0], [0], [1], [0, 0, 1, 1], [], []>} : vector<8x128xbf16>, vector<128x128xbf16>, vector<8x128xf32> -> vector<8x128xf32>
      %67 = arith.addf %58, %66 : vector<8x128xf32>
      %c2_i32_44 = arith.constant 2 : i32
      %68 = arith.addi %arg10, %c2_i32_44 : i32
      %69 = arith.index_cast %68 : i32 to index
      %c1_45 = arith.constant 1 : index
      %c0_46 = arith.constant 0 : index
      %70 = vector.load %arg9[%69, %c1_45, %c0_46] : memref<10x10x128xf32, #tpu.memory_space<vmem>>, vector<1x8x128xf32>
      %71 = vector.shape_cast %70 : vector<1x8x128xf32> to vector<8x128xf32>
      %72 = arith.truncf %71 : vector<8x128xf32> to vector<8x128xbf16>
      %c7 = arith.constant 7 : index
      %c0_47 = arith.constant 0 : index
      %c0_48 = arith.constant 0 : index
      %73 = vector.load %arg5[%c7, %c0_47, %c0_48] : memref<9x128x128xbf16, #tpu.memory_space<vmem>>, vector<1x128x128xbf16>
      %74 = vector.shape_cast %73 : vector<1x128x128xbf16> to vector<128x128xbf16>
      %cst_49 = arith.constant dense<0.000000e+00> : vector<8x128xf32>
      %75 = tpu.matmul %72, %74, %cst_49 {dimension_numbers = #tpu.dot_dimension_numbers<[1], [0], [0], [1], [0, 0, 1, 1], [], []>} : vector<8x128xbf16>, vector<128x128xbf16>, vector<8x128xf32> -> vector<8x128xf32>
      %76 = arith.addf %67, %75 : vector<8x128xf32>
      %c2_i32_50 = arith.constant 2 : i32
      %77 = arith.addi %arg10, %c2_i32_50 : i32
      %78 = arith.index_cast %77 : i32 to index
      %c2_51 = arith.constant 2 : index
      %c0_52 = arith.constant 0 : index
      %79 = vector.load %arg9[%78, %c2_51, %c0_52] : memref<10x10x128xf32, #tpu.memory_space<vmem>>, vector<1x8x128xf32>
      %80 = vector.shape_cast %79 : vector<1x8x128xf32> to vector<8x128xf32>
      %81 = arith.truncf %80 : vector<8x128xf32> to vector<8x128xbf16>
      %c8 = arith.constant 8 : index
      %c0_53 = arith.constant 0 : index
      %c0_54 = arith.constant 0 : index
      %82 = vector.load %arg5[%c8, %c0_53, %c0_54] : memref<9x128x128xbf16, #tpu.memory_space<vmem>>, vector<1x128x128xbf16>
      %83 = vector.shape_cast %82 : vector<1x128x128xbf16> to vector<128x128xbf16>
      %cst_55 = arith.constant dense<0.000000e+00> : vector<8x128xf32>
      %84 = tpu.matmul %81, %83, %cst_55 {dimension_numbers = #tpu.dot_dimension_numbers<[1], [0], [0], [1], [0, 0, 1, 1], [], []>} : vector<8x128xbf16>, vector<128x128xbf16>, vector<8x128xf32> -> vector<8x128xf32>
      %85 = arith.addf %76, %84 : vector<8x128xf32>
      %c2_i32_56 = arith.constant 2 : i32
      %86 = arith.muli %c2_i32_56, %arg10 : i32
      %c18_i32 = arith.constant 18 : i32
      %87 = arith.addi %c18_i32, %86 : i32
      %c1_i32_57 = arith.constant 1 : i32
      %88 = arith.addi %87, %c1_i32_57 : i32
      %c0_58 = arith.constant 0 : index
      %89 = arith.index_cast %88 : i32 to index
      %c0_59 = arith.constant 0 : index
      %c0_60 = arith.constant 0 : index
      %90 = vector.load %arg2[%c0_58, %89, %c0_59, %c0_60] : memref<1x54x8x4xbf16, #tpu.memory_space<vmem>>, vector<1x1x8x4xbf16>
      %91 = vector.shape_cast %90 : vector<1x1x8x4xbf16> to vector<8x4xbf16>
      %c0_61 = arith.constant 0 : index
      %c0_62 = arith.constant 0 : index
      %92 = vector.load %arg6[%c0_61, %c0_62] : memref<4x128xbf16, #tpu.memory_space<vmem>>, vector<4x128xbf16>
      %cst_63 = arith.constant dense<0.000000e+00> : vector<8x128xf32>
      %93 = tpu.matmul %91, %92, %cst_63 {dimension_numbers = #tpu.dot_dimension_numbers<[1], [0], [0], [1], [0, 0, 1, 1], [], []>} : vector<8x4xbf16>, vector<4x128xbf16>, vector<8x128xf32> -> vector<8x128xf32>
      %94 = arith.addf %85, %93 : vector<8x128xf32>
      %c0_64 = arith.constant 0 : index
      %c0_65 = arith.constant 0 : index
      %95 = vector.load %arg7[%c0_64, %c0_65] : memref<1x128xf32, #tpu.memory_space<vmem>>, vector<1x128xf32>
      %96 = vector.broadcast %95 : vector<1x128xf32> to vector<8x128xf32>
      %97 = arith.addf %94, %96 : vector<8x128xf32>
      %cst_66 = arith.constant 0.000000e+00 : f32
      %98 = vector.broadcast %cst_66 : f32 to vector<8x128xf32>
      %99 = arith.cmpf oge, %97, %98 : vector<8x128xf32>
      %cst_67 = arith.constant 0.00999999977 : f32
      %100 = vector.broadcast %cst_67 : f32 to vector<8x128xf32>
      %101 = arith.mulf %100, %97 : vector<8x128xf32>
      %102 = arith.select %99, %97, %101 : vector<8x128xi1>, vector<8x128xf32>
      %103 = arith.truncf %102 : vector<8x128xf32> to vector<8x128xbf16>
      %c0_68 = arith.constant 0 : index
      %104 = arith.index_cast %arg10 : i32 to index
      %c0_69 = arith.constant 0 : index
      %c0_70 = arith.constant 0 : index
      %105 = vector.load %arg8[%c0_68, %104, %c0_69, %c0_70] : memref<1x8x8x128xbf16, #tpu.memory_space<vmem>>, vector<1x1x8x128xbf16>
      %106 = vector.shape_cast %105 : vector<1x1x8x128xbf16> to vector<8x128xbf16>
      %107 = vector.shape_cast %103 : vector<8x128xbf16> to vector<1x1x8x128xbf16>
      tpu.vector_store %arg8[%c0_68, %104, %c0_69, %c0_70], %107 {strides = array<i32>} : memref<1x8x8x128xbf16, #tpu.memory_space<vmem>>, vector<1x1x8x128xbf16>,
    }
    %c8_i32_2 = arith.constant 8 : i32
    return
  }
  func.func @transform_0(%arg0: i32, %arg1: i32) -> (i32, i32, i32, i32) {
    %c0_i32 = arith.constant 0 : i32
    %c0_i32_0 = arith.constant 0 : i32
    %c0_i32_1 = arith.constant 0 : i32
    %c0_i32_2 = arith.constant 0 : i32
    return %arg0, %c0_i32, %c0_i32_0, %c0_i32_1 : i32, i32, i32, i32
  }
  func.func @transform_1(%arg0: i32, %arg1: i32) -> (i32, i32, i32) {
    %c0_i32 = arith.constant 0 : i32
    %c0_i32_0 = arith.constant 0 : i32
    %c0_i32_1 = arith.constant 0 : i32
    %c0_i32_2 = arith.constant 0 : i32
    return %c0_i32, %c0_i32_0, %c0_i32_1 : i32, i32, i32
  }
  func.func @transform_2(%arg0: i32, %arg1: i32) -> (i32, i32) {
    %c0_i32 = arith.constant 0 : i32
    %c0_i32_0 = arith.constant 0 : i32
    %c0_i32_1 = arith.constant 0 : i32
    return %c0_i32, %c0_i32_0 : i32, i32
  }
  func.func @transform_3(%arg0: i32, %arg1: i32) -> (i32, i32, i32) {
    %c0_i32 = arith.constant 0 : i32
    %c0_i32_0 = arith.constant 0 : i32
    %c0_i32_1 = arith.constant 0 : i32
    return %c0_i32, %c0_i32_0, %arg1 : i32, i32, i32
  }
  func.func @transform_4(%arg0: i32, %arg1: i32) -> (i32, i32) {
    %c0_i32 = arith.constant 0 : i32
    %c0_i32_0 = arith.constant 0 : i32
    return %c0_i32, %arg1 : i32, i32
  }
  func.func @transform_5(%arg0: i32, %arg1: i32) -> (i32, i32) {
    %c0_i32 = arith.constant 0 : i32
    %c0_i32_0 = arith.constant 0 : i32
    return %c0_i32, %arg1 : i32, i32
  }
  func.func @transform_6(%arg0: i32, %arg1: i32) -> (i32, i32, i32, i32) {
    %c0_i32 = arith.constant 0 : i32
    %c0_i32_0 = arith.constant 0 : i32
    %c0_i32_1 = arith.constant 0 : i32
    return %arg0, %c0_i32, %c0_i32_0, %arg1 : i32, i32, i32, i32
  }
}

</mosaic_0001>

<bundles_post_ra>
// kernel: tpu_custom_call.1
= control target key start
LH: loop header
LB: loop body
LE: loop exit
PB: predicated region body
PF: predicated region fallthrough
CT: control target
= control target key end

     0   :  { %11 = vsyncpa [#allocation4], 0  ;;  %s2487_s0 = inlined_call_operand.vmem [shape: bf16[2,54,8,4], index: 0, kind: input, shape index: {}]   ;;  %s2488_s1 = inlined_call_operand.vmem [shape: bf16[9,4,128], index: 1, kind: input, shape index: {}]   ;;  %s2489_s2 = inlined_call_operand.vmem [shape: f32[1,128], index: 2, kind: input, shape index: {}]   ;;  %s2490_s3 = inlined_call_operand.hbm [shape: bf16[9,128,128], index: 3, kind: input, shape index: {}]   ;;  %s2491_s4 = inlined_call_operand.vmem [shape: bf16[4,128], index: 4, kind: input, shape index: {}]   ;;  %s2492_s5 = inlined_call_operand.vmem [shape: f32[1,128], index: 5, kind: input, shape index: {}]   ;;  %s2493_s6 = inlined_call_operand.hbm [shape: bf16[2,8,8,128], index: 6, kind: output, shape index: {}]  }
   0x1   :  { %12 = vsyncpa [#allocation5], 0 }
   0x2   :  { %14 = vsyncpa [#allocation5 + $0x1], 0  ;;  %s2273_s21 = smov 0   ;;  %s2275_s22 = smov 0  }
   0x3   :  { %s2277_s23 = smov 0   ;;  %s2279_s24 = smov 0  }
   0x4   :  { %s2281_s25 = smov 0   ;;  %s2283_s26 = smov 0  }
   0x5 LB: > { %s1566_s27 = sadd.s32 4294967295, %s2222_s26   ;;  %s1567_s28 = sadd.s32 4294967294, %s2222_s26   ;;  %s2222_s26 = sphi %s2283_s26, %s20_s26   ;;  %s2218_s25 = sphi %s2281_s25, %s2500_s25   ;;  %s2214_s24 = sphi %s2279_s24, %s2499_s24   ;;  %s2210_s23 = sphi %s2277_s23, %s2498_s23   ;;  %s2206_s22 = sphi %s2275_s22, %s2497_s22   ;;  %s2202_s21 = sphi %s2273_s21, %s2496_s21  }
   0x6   : > { %s32_s29 = sadd.s32 1, %s2218_s25  ;;  %s187_s30 = sadd.s32 1, %s2210_s23 }
   0x7   : > { %p34_p0 = scmp.ge.s32.totalorder %s32_s29, 2  ;;  %p197_p1 = scmp.ne.s32.totalorder %s2210_s23, %s2206_s22 }
   0x8   : > { %p198_p2 = scmp.eq.s32.totalorder %s1566_s27, 1  ;;  %p203_p3 = scmp.ne.s32.totalorder %s2206_s22, %s2202_s21 }
   0x9   : > { %s2502_s29 = smov (%p34_p0, %s32_s29), 0  ;;  %p204_p5 = scmp.eq.s32.totalorder %s1567_s28, 1 }
   0xa   : > { %p2313_p4 = por %p198_p2, %p197_p1  ;;  %s182_s8 = ssub.s32 %s2218_s25, %s2502_s29 }
   0xb   : > { %p1568_p6 = scmp.ge.s32.totalorder %s2222_s26, 1  ;;  %p185_p7 = scmp.eq.s32.totalorder %s182_s8, 0 }
   0xc   : > { %p2320_p8 = por %p204_p5, %p203_p3  ;;  %p211_p9 = scmp.lt.s32.totalorder %s2222_s26, 3 }
   0xd   : > { %s2326_s10 = scalar_select %p185_p7, %s2210_s23, %s187_s30  }
   0xe   : > { %p212_p10 = pnand %p1568_p6, %p211_p9  ;;  %p2027_p11 = scmp.eq.s32.totalorder %s1566_s27, 0 }
   0xf   : > { %s230_s13 = sshll.u32 %s2490_s3, 4  ;;  %s2232_s14 = smov [#allocation3]   ;;  %s231_s13 = int_to_ptr.hbm [resolvable:$true] %s230_s13 }
  0x10   : > { %p2019_p12 = pneg %p212_p10  ;;  %s232_s15 = sshll.u32 %s2232_s14, 4  ;;  %s233_s15 = int_to_ptr.vmem [resolvable:$true] %s232_s15 }
  0x11   : > { %s2233_s16 = smov 64   ;;  %s2234_s17 = smov 4  }
  0x12   : > { %p2020_p13 = pnand %p2027_p11, %p2019_p12  ;;  %269 = sbr.rel (%p212_p10) target bundleno = 459 (0x1cb), region = 44 }
  0x14   : > { %2022 = dma.hbm_to_vmem [thread:$0]  (!%p2020_p13), %s231_s13, 9216, %s233_s15, [#allocation4], %s2233_s16, %s2233_s16, %s2234_s17  }
  0x17   : > { %2193 = dma.done.wait (%p2027_p11), [#allocation4], 9216  }
  0x18   : > { %2195 = vsyncadd (%p2027_p11), [#allocation4], 4294958080  ;;  %s304_s18 = sand.u32 1, %s2206_s22   ;;  %p307_p0 = scmp.lt.s32.totalorder %s2214_s24, 1  ;;  %v2235_v0 = vmov 0.0  }
  0x19   : > { %s2335_s19 = sshll.u32 %s304_s18, 5  ;;  %324 = vst [vmem:[#allocation2] sm:$0xff] %v2235_v0  ;;  %s2344_s12 = smov 0  }
  0x1a   : > { %325 = vst [vmem:[#allocation2 + $0x8] sm:$0x3] %v2235_v0  ;;  %s308_s20 = scalar_select %p307_p0, %s2214_s24, 1 }
  0x1b   : > { %326 = vst [vmem:[#allocation2 + $0x10] sm:$0xff] %v2235_v0  ;;  %s306_s11 = scalar_lea.vmem [#allocation6], %s2335_s19 }
  0x1c   : > { %327 = vst [vmem:[#allocation2 + $0x18] sm:$0x3] %v2235_v0  ;;  %s2012_s27 = smul.u32 216, %s308_s20 }
  0x1d   : > { %328 = vst [vmem:[#allocation2 + $0x20] sm:$0xff] %v2235_v0 }
  0x1e   : > { %329 = vst [vmem:[#allocation2 + $0x28] sm:$0x3] %v2235_v0  ;;  %s2341_s8 = scalar_lea.vmem %s2487_s0, %s2012_s27 }
  0x1f   : > { %330 = vst [vmem:[#allocation2 + $0x30] sm:$0xff] %v2235_v0 }
  0x20   : > { %331 = vst [vmem:[#allocation2 + $0x38] sm:$0x3] %v2235_v0 }
  0x21   : > { %332 = vst [vmem:[#allocation2 + $0x40] sm:$0xff] %v2235_v0 }
  0x22   : > { %333 = vst [vmem:[#allocation2 + $0x48] sm:$0x3] %v2235_v0 }
  0x23   : > { %334 = vst [vmem:[#allocation2 + $0x50] sm:$0xff] %v2235_v0 }
  0x24   : > { %335 = vst [vmem:[#allocation2 + $0x58] sm:$0x3] %v2235_v0 }
  0x25   : > { %336 = vst [vmem:[#allocation2 + $0x60] sm:$0xff] %v2235_v0 }
  0x26   : > { %337 = vst [vmem:[#allocation2 + $0x68] sm:$0x3] %v2235_v0 }
  0x27   : > { %338 = vst [vmem:[#allocation2 + $0x70] sm:$0xff] %v2235_v0 }
  0x28   : > { %339 = vst [vmem:[#allocation2 + $0x78] sm:$0x3] %v2235_v0 }
  0x29   : > { %340 = vst [vmem:[#allocation2 + $0x80] sm:$0xff] %v2235_v0 }
  0x2a   : > { %341 = vst [vmem:[#allocation2 + $0x88] sm:$0x3] %v2235_v0 }
  0x2b   : > { %342 = vst [vmem:[#allocation2 + $0x90] sm:$0xff] %v2235_v0 }
  0x2c   : > { %343 = vst [vmem:[#allocation2 + $0x98] sm:$0x3] %v2235_v0 }
  0x2d LB: >> { %v1582_v1 = vld [vmem:[%s2488_s1 + $0x2] sm:$0x3]  ;;  %vm365_vm0 = vcmask 1041408   ;;  %v354_v2 = vld [vmem:[%s2488_s1] sm:$0x3]  ;;  %s1929_s30 = sshll.u32 %s2226_s12, 3  ;;  %s2226_s12 = sphi %s2344_s12, %s349_s12  }
  0x2e   : >> { %v367_v3 = vsel %vm365_vm0, %v1582_v1, 0  ;;  %v386_v4 = vsel %vm365_vm0, %v354_v2, 0  ;;  %v1588_v5 = vld [vmem:[%s2488_s1 + $0x4] sm:$0x3]  ;;  %v1593_v6 = vld [vmem:[%s2488_s1 + $0x6] sm:$0x3]  ;;  %s2370_s15 = scalar_lea.vmem %s2341_s8, %s1929_s30 }
  0x2f   : >> { %376 = vmatpush.bf16.msra.mxu0 %v367_v3  ;;  %395 = vmatpush.bf16.msra.mxu1 %v386_v4  ;;  %v411_v7 = vsel %vm365_vm0, %v1588_v5, 0  ;;  %v437_v8 = vsel %vm365_vm0, %v1593_v6, 0  ;;  %vm361_vm1 = vcmask 31744   ;;  %v1598_v9 = vld [vmem:[%s2488_s1 + $0x8] sm:$0x3]  ;;  %s1620_s17 = sshll.u32 %s2226_s12, 4 }
  0x30   : >> { %420 = vmatpush.bf16.msra.mxu2 %v411_v7  ;;  %446 = vmatpush.bf16.msra.mxu3 %v437_v8  ;;  %v463_v10 = vsel %vm365_vm0, %v1598_v9, 0  ;;  %v1608_v11 = vld [vmem:[%s2488_s1 + $0xc] sm:$0x3]  ;;  %v1613_v12 = vld [vmem:[%s2488_s1 + $0xe] sm:$0x3]  ;;  %s1474_s20 = scalar_lea.vmem [#allocation2], %s1620_s17 }
  0x31   : >> { %v1581_v13 = vld [vmem:[%s2370_s15 + $0x48] sm:$0xf]  ;;  %v353_v14 = vld [vmem:[%s2370_s15] sm:$0xf]  ;;  %v1587_v15 = vld [vmem:[%s2370_s15 + $0x90] sm:$0xf] }
  0x32   : >> { %1583 = vmatmul.msk.bf16.vlgmr.msra.gmra.mxu0 %vm361_vm1, %v1581_v13  ;;  %1584 = vmatmul.msk.bf16.vlgmr.msra.gmra.mxu1 %vm361_vm1, %v353_v14  ;;  %v1592_v16 = vld [vmem:[%s2370_s15 + $0x4] sm:$0xf]  ;;  %v515_v17 = vsel %vm365_vm0, %v1608_v11, 0  ;;  %v541_v18 = vsel %vm365_vm0, %v1613_v12, 0  ;;  %v1603_v19 = vld [vmem:[%s2488_s1 + $0xa] sm:$0x3] }
  0x33   : >> { %472 = vmatpush.bf16.msrb.mxu0 %v463_v10  ;;  %1589 = vmatmul.msk.bf16.vlgmr.msra.gmra.mxu2 %vm361_vm1, %v1587_v15  ;;  %v489_v20 = vsel %vm365_vm0, %v1603_v19, 0  ;;  %v1618_v21 = vld [vmem:[%s2488_s1 + $0x10] sm:$0x3]  ;;  %v1597_v23 = vld [vmem:[%s2370_s15 + $0x4c] sm:$0xf]  ;;  %s349_s12 = sadd.s32 1, %s2226_s12  }
  0x34   : >> { %1594 = vmatmul.msk.bf16.vlgmr.msra.gmra.mxu3 %vm361_vm1, %v1592_v16  ;;  %524 = vmatpush.bf16.msrb.mxu2 %v515_v17  ;;  %v567_v22 = vsel %vm365_vm0, %v1618_v21, 0  ;;  %v1602_v24 = vld [vmem:[%s2370_s15 + $0x94] sm:$0xf]  ;;  %v1607_v25 = vld [vmem:[%s2370_s15 + $0x8] sm:$0xf]  ;;  %p346_p1 = scmp.ge.s32.totalorder %s349_s12, 8  }
  0x35   : >> { %550 = vmatpush.bf16.msrb.mxu3 %v541_v18  ;;  %498 = vmatpush.bf16.msrb.mxu1 %v489_v20  ;;  %v1612_v26 = vld [vmem:[%s2370_s15 + $0x50] sm:$0xf]  ;;  %v1617_v27 = vld [vmem:[%s2370_s15 + $0x98] sm:$0xf]  ;;  %v2100_v51 = vld [vmem:[%s2489_s2] ss:$0 sm:$0xff] }
  0x36   : > { %s2414_s27 = smov (%p346_p1), 0  }
  0x37   : >> { %576 = vmatpush.bf16.msra.mxu0 %v567_v22 }
  0x42   : >> { %1599 = vmatmul.msk.bf16.vlgmr.msrb.gmra.mxu0 %vm361_vm1, %v1597_v23  ;;  %1604 = vmatmul.msk.bf16.vlgmr.msrb.gmra.mxu1 %vm361_vm1, %v1602_v24 }
  0x43   : >> { %1609 = vmatmul.msk.bf16.vlgmr.msrb.gmra.mxu2 %vm361_vm1, %v1607_v25 }
  0x44   : >> { %1614 = vmatmul.msk.bf16.vlgmr.msrb.gmra.mxu3 %vm361_vm1, %v1612_v26 }
  0x52   : >> { %1619 = vmatmul.msk.bf16.vlgmr.msra.gmra.mxu0 %vm361_vm1, %v1617_v27 }
  0xaf   : >> { %v378_v28 = vpop.f32.mrf.mxu0  ;;  %v397_v29 = vpop.f32.mrf.mxu1 }
  0xb0   : >> { %v398_v34 = vadd.f32 %v397_v29, %v378_v28 }
  0xb6   : >> { %v422_v30 = vpop.f32.mrf.mxu2 }
  0xb7   : >> { %v448_v31 = vpop.f32.mrf.mxu3  ;;  %v380_v32 = vpop.f32.mrf.mxu0  ;;  %v426_v35 = vadd.f32 %v422_v30, %v398_v34 }
  0xb8   : >> { %v399_v33 = vpop.f32.mrf.mxu1 }
  0xb9   : >> { %v452_v40 = vadd.f32 %v448_v31, %v426_v35 }
  0xbe   : >> { %v424_v36 = vpop.f32.mrf.mxu2 }
  0xbf   : >> { %v450_v37 = vpop.f32.mrf.mxu3  ;;  %v474_v38 = vpop.f32.mrf.mxu0 }
  0xc0   : >> { %v500_v39 = vpop.f32.mrf.mxu1  ;;  %v478_v41 = vadd.f32 %v474_v38, %v452_v40 }
  0xc2   : >> { %v504_v46 = vadd.f32 %v500_v39, %v478_v41 }
  0xc6   : >> { %v526_v42 = vpop.f32.mrf.mxu2 }
  0xc7   : >> { %v552_v43 = vpop.f32.mrf.mxu3  ;;  %v476_v44 = vpop.f32.mrf.mxu0  ;;  %v530_v47 = vadd.f32 %v526_v42, %v504_v46 }
  0xc8   : >> { %v502_v45 = vpop.f32.mrf.mxu1 }
  0xc9   : >> { %v556_v48 = vadd.f32 %v552_v43, %v530_v47 }
  0xce   : >> { %v528_v49 = vpop.f32.mrf.mxu2 }
  0xcf   : >> { %v554_v50 = vpop.f32.mrf.mxu3  ;;  %v578_v52 = vpop.f32.mrf.mxu0 }
  0xd0   : >> { %v582_v53 = vadd.f32 %v578_v52, %v556_v48 }
  0xd2   : >> { %v587_v54 = vadd.f32 %v2100_v51, %v582_v53 }
  0xd3   : > { %348 = sbr.rel (!%p346_p1) target bundleno = 45 (0x2d), region = 140 }
  0xd4   : >> { %vm588_vm2 = vcmp.ge.f32.partialorder %v587_v54, 0.0  ;;  %v589_v55 = vmul.f32 0.01, %v587_v54 }
  0xd6   : >> { %v590_v56 = vsel %vm588_vm2, %v587_v54, %v589_v55 }
  0xd7   : >> { %1621 = vst [vmem:[%s1474_s20 + $0x11] sm:$0xff] %v590_v56  ;;  %v580_v57 = vpop.f32.mrf.mxu0 }
  0xd8 LB: >> { %v1953_v58 = vld [vmem:[#allocation3 + $0x78] sm:$0xff]  ;;  %v1952_v62 = vld [vmem:[#allocation3 + $0x70] sm:$0xff]  ;;  %v1951_v2 = vld [vmem:[#allocation3 + $0x68] sm:$0xff]  ;;  %s1622_s12 = sshll.u32 %s2230_s27, 4  ;;  %s2010_s14 = sshll.u32 %s2230_s27, 3  ;;  %s2230_s27 = sphi %s2414_s27, %s600_s27  }
  0xd9   : >> { %v1961_v59 = vld [vmem:[#allocation3 + $0xb8] sm:$0xff]  ;;  %688 = vmatpush.bf16.msra.mxu0 %v1953_v58  ;;  %v1960_v63 = vld [vmem:[#allocation3 + $0xb0] sm:$0xff]  ;;  %v1959_v3 = vld [vmem:[#allocation3 + $0xa8] sm:$0xff]  ;;  %s2420_s28 = scalar_lea.vmem [#allocation2], %s1622_s12  ;;  %s1486_s15 = scalar_lea.vmem %s2341_s8, %s2010_s14 }
  0xda   : >> { %v1969_v60 = vld [vmem:[#allocation3 + $0xf8] sm:$0xff]  ;;  %829 = vmatpush.bf16.msra.mxu2 %v1961_v59  ;;  %v1968_v0 = vld [vmem:[#allocation3 + $0xf0] sm:$0xff]  ;;  %v1967_v4 = vld [vmem:[#allocation3 + $0xe8] sm:$0xff]  ;;  %s1923_s20 = sshll.u32 %s2230_s27, 2  ;;  %s600_s27 = sadd.s32 1, %s2230_s27  }
  0xdb   : >> { %v1945_v61 = vld [vmem:[#allocation3 + $0x38] sm:$0xff]  ;;  %913 = vmatpush.bf16.msra.mxu3 %v1969_v60  ;;  %v1944_v1 = vld [vmem:[#allocation3 + $0x30] sm:$0xff]  ;;  %v1943_v5 = vld [vmem:[#allocation3 + $0x28] sm:$0xff]  ;;  %s1373_s12 = scalar_lea.vmem %s306_s11, %s1923_s20 [#allocation6]  ;;  %p597_p2 = scmp.ge.s32.totalorder %s600_s27, 8  }
  0xdc   : >> { %749 = vmatpush.bf16.msra.mxu1 %v1945_v61  ;;  %v1950_v6 = vld [vmem:[#allocation3 + $0x60] sm:$0xff]  ;;  %v1949_v10 = vld [vmem:[#allocation3 + $0x58] sm:$0xff]  ;;  %v1948_v14 = vld [vmem:[#allocation3 + $0x50] sm:$0xff]  ;;  %s1376_s17 = scalar_lea.sflag (%p597_p2), [#allocation5], %s304_s18 }
  0xdd   : >> { %689 = vmatpush.bf16.msra.mxu0 %v1952_v62  ;;  %v1958_v7 = vld [vmem:[#allocation3 + $0xa0] sm:$0xff]  ;;  %v1957_v11 = vld [vmem:[#allocation3 + $0x98] sm:$0xff]  ;;  %v1956_v15 = vld [vmem:[#allocation3 + $0x90] sm:$0xff] }
  0xde   : >> { %830 = vmatpush.bf16.msra.mxu2 %v1960_v63  ;;  %v1966_v8 = vld [vmem:[#allocation3 + $0xe0] sm:$0xff]  ;;  %v1965_v12 = vld [vmem:[#allocation3 + $0xd8] sm:$0xff]  ;;  %v1964_v16 = vld [vmem:[#allocation3 + $0xd0] sm:$0xff] }
  0xdf   : >> { %914 = vmatpush.bf16.msra.mxu3 %v1968_v0  ;;  %v1942_v9 = vld [vmem:[#allocation3 + $0x20] sm:$0xff]  ;;  %v1941_v13 = vld [vmem:[#allocation3 + $0x18] sm:$0xff]  ;;  %v1940_v17 = vld [vmem:[#allocation3 + $0x10] sm:$0xff] }
  0xe0   : >> { %750 = vmatpush.bf16.msra.mxu1 %v1944_v1  ;;  %v1947_v18 = vld [vmem:[#allocation3 + $0x48] sm:$0xff]  ;;  %v1946_v22 = vld [vmem:[#allocation3 + $0x40] sm:$0xff]  ;;  %v1977_v24 = vld [vmem:[#allocation3 + $0x138] sm:$0xff] }
  0xe1   : >> { %690 = vmatpush.bf16.msra.mxu0 %v1951_v2  ;;  %v1955_v19 = vld [vmem:[#allocation3 + $0x88] sm:$0xff]  ;;  %v1954_v23 = vld [vmem:[#allocation3 + $0x80] sm:$0xff]  ;;  %v1993_v25 = vld [vmem:[#allocation3 + $0x1b8] sm:$0xff] }
  0xe2   : >> { %831 = vmatpush.bf16.msra.mxu2 %v1959_v3  ;;  %v1963_v20 = vld [vmem:[#allocation3 + $0xc8] sm:$0xff]  ;;  %v1962_v28 = vld [vmem:[#allocation3 + $0xc0] sm:$0xff]  ;;  %v2001_v29 = vld [vmem:[#allocation3 + $0x1f8] sm:$0xff] }
  0xe3   : >> { %915 = vmatpush.bf16.msra.mxu3 %v1967_v4  ;;  %v1939_v21 = vld [vmem:[#allocation3 + $0x8] sm:$0xff]  ;;  %v1938_v30 = vld [vmem:[#allocation3] sm:$0xff]  ;;  %v1985_v31 = vld [vmem:[#allocation3 + $0x178] sm:$0xff] }
  0xe4   : >> { %751 = vmatpush.bf16.msra.mxu1 %v1943_v5  ;;  %v762_v26 = vld [vmem:[%s2420_s28 + $0x2] sm:$0xff]  ;;  %v1720_v32 = vld [vmem:[%s2420_s28 + $0x10] sm:$0xff]  ;;  %v1973_v50 = vld [vmem:[#allocation3 + $0x118] sm:$0xff] }
  0xe5   : >> { %691 = vmatpush.bf16.msra.mxu0 %v1950_v6  ;;  %v621_v27 = vld [vmem:[%s2420_s28 + $0x1] sm:$0xff]  ;;  %v763_v34 = vpack.c.bf16 %v762_v26, %v762_v26  ;;  %v1976_v36 = vld [vmem:[#allocation3 + $0x130] sm:$0xff]  ;;  %v847_v38 = vpack.c.bf16 %v1720_v32, %v1720_v32  ;;  %v1989_v51 = vld [vmem:[#allocation3 + $0x198] sm:$0xff] }
  0xe6   : >> { %832 = vmatpush.bf16.msra.mxu2 %v1958_v7  ;;  %v603_v33 = vld [vmem:[%s2420_s28] sm:$0xff]  ;;  %v622_v35 = vpack.c.bf16 %v621_v27, %v621_v27  ;;  %v1992_v37 = vld [vmem:[#allocation3 + $0x1b0] sm:$0xff]  ;;  %v1975_v42 = vld [vmem:[#allocation3 + $0x128] sm:$0xff] }
  0xe7   : >> { %916 = vmatpush.bf16.msra.mxu3 %v1966_v8  ;;  %v604_v39 = vpack.c.bf16 %v603_v33, %v603_v33  ;;  %v2000_v40 = vld [vmem:[#allocation3 + $0x1f0] sm:$0xff]  ;;  %v1991_v43 = vld [vmem:[#allocation3 + $0x1a8] sm:$0xff]  ;;  %v1974_v46 = vld [vmem:[#allocation3 + $0x120] sm:$0xff] }
  0xe8   : >> { %752 = vmatpush.bf16.msra.mxu1 %v1942_v9  ;;  %v1984_v41 = vld [vmem:[#allocation3 + $0x170] sm:$0xff]  ;;  %v1999_v44 = vld [vmem:[#allocation3 + $0x1e8] sm:$0xff]  ;;  %v1990_v47 = vld [vmem:[#allocation3 + $0x1a0] sm:$0xff] }
  0xe9   : >> { %692 = vmatpush.bf16.msra.mxu0 %v1949_v10  ;;  %v1983_v45 = vld [vmem:[#allocation3 + $0x168] sm:$0xff]  ;;  %v1998_v48 = vld [vmem:[#allocation3 + $0x1e0] sm:$0xff]  ;;  %v1997_v52 = vld [vmem:[#allocation3 + $0x1d8] sm:$0xff] }
  0xea   : >> { %833 = vmatpush.bf16.msra.mxu2 %v1957_v11  ;;  %v1982_v49 = vld [vmem:[#allocation3 + $0x160] sm:$0xff]  ;;  %v1981_v53 = vld [vmem:[#allocation3 + $0x158] sm:$0xff]  ;;  %v1972_v54 = vld [vmem:[#allocation3 + $0x110] sm:$0xff] }
  0xeb   : >> { %917 = vmatpush.bf16.msra.mxu3 %v1965_v12  ;;  %v1988_v55 = vld [vmem:[#allocation3 + $0x190] sm:$0xff]  ;;  %v1971_v58 = vld [vmem:[#allocation3 + $0x108] sm:$0xff]  ;;  %v1970_v62 = vld [vmem:[#allocation3 + $0x100] sm:$0xff] }
  0xec   : >> { %753 = vmatpush.bf16.msra.mxu1 %v1941_v13  ;;  %v1996_v56 = vld [vmem:[#allocation3 + $0x1d0] sm:$0xff]  ;;  %v1987_v59 = vld [vmem:[#allocation3 + $0x188] sm:$0xff]  ;;  %v1986_v63 = vld [vmem:[#allocation3 + $0x180] sm:$0xff] }
  0xed   : >> { %693 = vmatpush.bf16.msra.mxu0 %v1948_v14  ;;  %v1980_v57 = vld [vmem:[#allocation3 + $0x150] sm:$0xff]  ;;  %v1995_v60 = vld [vmem:[#allocation3 + $0x1c8] sm:$0xff]  ;;  %v1820_v0 = vld [vmem:[%s2420_s28 + $0x20] sm:$0xff] }
  0xee   : >> { %834 = vmatpush.bf16.msra.mxu2 %v1956_v15  ;;  %v1979_v61 = vld [vmem:[#allocation3 + $0x148] sm:$0xff]  ;;  %v1753_v1 = vld [vmem:[%s2420_s28 + $0x11] sm:$0xff]  ;;  %v1994_v3 = vld [vmem:[#allocation3 + $0x1c0] sm:$0xff]  ;;  %v1093_v7 = vpack.c.bf16 %v1820_v0, %v1820_v0 }
  0xef   : >> { %918 = vmatpush.bf16.msra.mxu3 %v1964_v16  ;;  %v2009_v2 = vld [vmem:[#allocation3 + $0x238] sm:$0xff]  ;;  %v1978_v4 = vld [vmem:[#allocation3 + $0x140] sm:$0xff]  ;;  %v928_v8 = vpack.c.bf16 %v1753_v1, %v1753_v1  ;;  %v2008_v10 = vld [vmem:[#allocation3 + $0x230] sm:$0xff] }
  0xf0   : >> { %754 = vmatpush.bf16.msra.mxu1 %v1940_v17  ;;  %v1853_v5 = vld [vmem:[%s2420_s28 + $0x21] sm:$0xff]  ;;  %v1786_v9 = vld [vmem:[%s2420_s28 + $0x12] sm:$0xff] }
  0xf1   : >> { %694 = vmatpush.bf16.msra.mxu0 %v1947_v18  ;;  %v1340_v6 = vld [vmem:[%s2491_s4] sm:$0x3]  ;;  %v1174_v11 = vpack.c.bf16 %v1853_v5, %v1853_v5  ;;  %v1009_v13 = vpack.c.bf16 %v1786_v9, %v1786_v9  ;;  %v2007_v14 = vld [vmem:[#allocation3 + $0x228] sm:$0xff]  ;;  %v2005_v16 = vld [vmem:[#allocation3 + $0x218] sm:$0xff] }
  0xf2   : >> { %835 = vmatpush.bf16.msra.mxu2 %v1955_v19  ;;  %v1347_v12 = vsel %vm365_vm0, %v1340_v6, 0  ;;  %v2006_v15 = vld [vmem:[#allocation3 + $0x220] sm:$0xff]  ;;  %v2004_v17 = vld [vmem:[#allocation3 + $0x210] sm:$0xff]  ;;  %v1921_v18 = vld [vmem:[%s1486_s15 + $0x4c] sm:$0xf]  ;;  %s1389_s15 = sshll.u32 (%p597_p2), %s306_s11, 4  ;;  %s1390_s15 = int_to_ptr.vmem [resolvable:$true] %s1389_s15 }
  0xf3   : >> { %919 = vmatpush.bf16.msra.mxu3 %v1963_v20  ;;  %v2003_v19 = vld [vmem:[#allocation3 + $0x208] sm:$0xff]  ;;  %v2002_v20 = vld [vmem:[#allocation3 + $0x200] sm:$0xff] }
  0xf4   : >> { %755 = vmatpush.bf16.msra.mxu1 %v1939_v21  ;;  %v1886_v21 = vld [vmem:[%s2420_s28 + $0x22] sm:$0xff]  ;;  %s2011_s28 = sshll.u32 (%p597_p2), %s2214_s24, 5 }
  0xf5   : >> { %695 = vmatpush.bf16.msra.mxu0 %v1946_v22  ;;  %v1255_v22 = vpack.c.bf16 %v1886_v21, %v1886_v21  ;;  %s1388_s14 = scalar_lea.hbm (%p597_p2), %s2493_s6, %s2011_s28 }
  0xf6   : >> { %836 = vmatpush.bf16.msra.mxu2 %v1954_v23  ;;  %s1391_s16 = sshll.u32 (%p597_p2), %s1388_s14, 4  ;;  %s1392_s16 = int_to_ptr.hbm [resolvable:$true] %s1391_s16 }
  0xf7   : >> { %920 = vmatpush.bf16.msra.mxu3 %v1962_v28  ;;  %s2146_s20 = sshra.s32 (%p597_p2), %s1392_s16, 4  ;;  %s2147_s20 = int_to_ptr.hbm [resolvable:$true] %s2146_s20 }
  0xf8   : >> { %756 = vmatpush.bf16.msra.mxu1 %v1938_v30  ;;  %696 = vmatmul.bf16.vlgmr.msra.gmra.mxu0 %v622_v35  ;;  %s2148_s27 = scalar_lea.hbm (%p597_p2), %s2147_s20, 32  ;;  %p2153_p7 = scmp.lt.s32.totalorder (%p597_p2), %s2147_s20, %s2493_s6 }
  0xf9   : >> { %994 = vmatpush.bf16.msrb.mxu0 %v1977_v24  ;;  %837 = vmatmul.bf16.vlgmr.msra.gmra.mxu2 %v763_v34  ;;  %p2149_p3 = scmp.ne.s32.totalorder (%p597_p2), %s2147_s20, %s2148_s27 }
  0xfa   : >> { %1159 = vmatpush.bf16.msrb.mxu2 %v1993_v25  ;;  %921 = vmatmul.bf16.vlgmr.msra.gmra.mxu3 %v847_v38 }
  0xfb   : >> { %1240 = vmatpush.bf16.msrb.mxu3 %v2001_v29  ;;  %757 = vmatmul.bf16.vlgmr.msra.gmra.mxu1 %v604_v39  ;;  %p2150_p5 = pnand (%p597_p2), %p2149_p3, %p2313_p4 }
  0xfc   : >> { %1075 = vmatpush.bf16.msrb.mxu1 %v1985_v31 }
  0xfd   : >> { %995 = vmatpush.bf16.msrb.mxu0 %v1976_v36  ;;  %p2151_p6 = pneg (%p597_p2), %p2150_p5 }
  0xfe   : >> { %1160 = vmatpush.bf16.msrb.mxu2 %v1992_v37 }
  0xff   : >> { %1241 = vmatpush.bf16.msrb.mxu3 %v2000_v40 }
 0x100   : >> { %1076 = vmatpush.bf16.msrb.mxu1 %v1984_v41 }
 0x101   : >> { %996 = vmatpush.bf16.msrb.mxu0 %v1975_v42 }
 0x102   : >> { %1161 = vmatpush.bf16.msrb.mxu2 %v1991_v43 }
 0x103   : >> { %1242 = vmatpush.bf16.msrb.mxu3 %v1999_v44 }
 0x104   : >> { %1077 = vmatpush.bf16.msrb.mxu1 %v1983_v45 }
 0x105   : >> { %997 = vmatpush.bf16.msrb.mxu0 %v1974_v46 }
 0x106   : >> { %1162 = vmatpush.bf16.msrb.mxu2 %v1990_v47 }
 0x107   : >> { %1243 = vmatpush.bf16.msrb.mxu3 %v1998_v48 }
 0x108   : >> { %1078 = vmatpush.bf16.msrb.mxu1 %v1982_v49 }
 0x109   : >> { %998 = vmatpush.bf16.msrb.mxu0 %v1973_v50  ;;  %v2101_v50 = vld [vmem:[%s2492_s5] ss:$0 sm:$0xff] }
 0x10a   : >> { %1163 = vmatpush.bf16.msrb.mxu2 %v1989_v51 }
 0x10b   : >> { %1244 = vmatpush.bf16.msrb.mxu3 %v1997_v52 }
 0x10c   : >> { %1079 = vmatpush.bf16.msrb.mxu1 %v1981_v53 }
 0x10d   : >> { %999 = vmatpush.bf16.msrb.mxu0 %v1972_v54 }
 0x10e   : >> { %1164 = vmatpush.bf16.msrb.mxu2 %v1988_v55 }
 0x10f   : >> { %1245 = vmatpush.bf16.msrb.mxu3 %v1996_v56 }
 0x110   : >> { %1080 = vmatpush.bf16.msrb.mxu1 %v1980_v57 }
 0x111   : >> { %1000 = vmatpush.bf16.msrb.mxu0 %v1971_v58 }
 0x112   : >> { %1165 = vmatpush.bf16.msrb.mxu2 %v1987_v59 }
 0x113   : >> { %1246 = vmatpush.bf16.msrb.mxu3 %v1995_v60 }
 0x114   : >> { %1081 = vmatpush.bf16.msrb.mxu1 %v1979_v61 }
 0x115   : >> { %1001 = vmatpush.bf16.msrb.mxu0 %v1970_v62 }
 0x116   : >> { %1166 = vmatpush.bf16.msrb.mxu2 %v1986_v63 }
 0x117   : >> { %1247 = vmatpush.bf16.msrb.mxu3 %v1994_v3 }
 0x118   : >> { %1082 = vmatpush.bf16.msrb.mxu1 %v1978_v4  ;;  %1002 = vmatmul.bf16.vlgmr.msrb.gmra.mxu0 %v928_v8 }
 0x119   : >> { %1321 = vmatpush.bf16.msra.mxu0 %v2009_v2  ;;  %1167 = vmatmul.bf16.vlgmr.msrb.gmra.mxu2 %v1093_v7 }
 0x11a   : >> { %1248 = vmatmul.bf16.vlgmr.msrb.gmra.mxu3 %v1174_v11 }
 0x11b   : >> { %1083 = vmatmul.bf16.vlgmr.msrb.gmra.mxu1 %v1009_v13 }
 0x11c   : >> { %1356 = vmatpush.bf16.msra.mxu1 %v1347_v12 }
 0x11d   : >> { %1322 = vmatpush.bf16.msra.mxu0 %v2008_v10 }
 0x121   : >> { %1323 = vmatpush.bf16.msra.mxu0 %v2007_v14 }
 0x125   : >> { %1324 = vmatpush.bf16.msra.mxu0 %v2006_v15 }
 0x129   : >> { %1325 = vmatpush.bf16.msra.mxu0 %v2005_v16 }
 0x12b   : >> { %1922 = vmatmul.msk.bf16.vlgmr.msra.gmra.mxu1 %vm361_vm1, %v1921_v18 }
 0x12d   : >> { %1326 = vmatpush.bf16.msra.mxu0 %v2004_v17 }
 0x131   : >> { %1327 = vmatpush.bf16.msra.mxu0 %v2003_v19 }
 0x135   : >> { %1328 = vmatpush.bf16.msra.mxu0 %v2002_v20 }
 0x138   : >> { %1329 = vmatmul.bf16.vlgmr.msra.gmra.mxu0 %v1255_v22 }
 0x175   : >> { %v697_v23 = vpop.f32.mrf.mxu0 }
 0x178   : >> { %v758_v24 = vpop.f32.mrf.mxu1 }
 0x179   : >> { %v759_v33 = vadd.f32 %v758_v24, %v697_v23 }
 0x17c   : >> { %v838_v25 = vpop.f32.mrf.mxu2 }
 0x17d   : >> { %v922_v26 = vpop.f32.mrf.mxu3  ;;  %v699_v27 = vpop.f32.mrf.mxu0  ;;  %v842_v35 = vadd.f32 %v838_v25, %v759_v33 }
 0x17f   : >> { %v926_v39 = vadd.f32 %v922_v26, %v842_v35 }
 0x180   : >> { %v760_v28 = vpop.f32.mrf.mxu1 }
 0x184   : >> { %v840_v29 = vpop.f32.mrf.mxu2 }
 0x185   : >> { %v924_v30 = vpop.f32.mrf.mxu3 }
 0x195   : >> { %v1003_v31 = vpop.f32.mrf.mxu0 }
 0x196   : >> { %v1007_v41 = vadd.f32 %v1003_v31, %v926_v39 }
 0x198   : >> { %v1084_v32 = vpop.f32.mrf.mxu1 }
 0x199   : >> { %v1088_v44 = vadd.f32 %v1084_v32, %v1007_v41 }
 0x19c   : >> { %v1168_v34 = vpop.f32.mrf.mxu2 }
 0x19d   : >> { %v1249_v36 = vpop.f32.mrf.mxu3  ;;  %v1005_v37 = vpop.f32.mrf.mxu0  ;;  %v1172_v45 = vadd.f32 %v1168_v34, %v1088_v44 }
 0x19f   : >> { %v1253_v47 = vadd.f32 %v1249_v36, %v1172_v45 }
 0x1a0   : >> { %v1086_v38 = vpop.f32.mrf.mxu1 }
 0x1a4   : >> { %v1170_v40 = vpop.f32.mrf.mxu2 }
 0x1a5   : >> { %v1251_v42 = vpop.f32.mrf.mxu3 }
 0x1a8   : >> { %v1358_v43 = vpop.f32.mrf.mxu1 }
 0x1b0   : >> { %v1360_v46 = vpop.f32.mrf.mxu1 }
 0x1b5   : >> { %v1330_v48 = vpop.f32.mrf.mxu0 }
 0x1b6   : >> { %v1334_v49 = vadd.f32 %v1330_v48, %v1253_v47 }
 0x1b8   : >> { %v1362_v51 = vadd.f32 %v1358_v43, %v1334_v49 }
 0x1ba   : >> { %v1367_v52 = vadd.f32 %v2101_v50, %v1362_v51 }
 0x1bc   : >> { %vm1368_vm3 = vcmp.ge.f32.partialorder %v1367_v52, 0.0  ;;  %v1369_v53 = vmul.f32 0.01, %v1367_v52 }
 0x1bd   : >> { %v1332_v54 = vpop.f32.mrf.mxu0  ;;  %599 = sbr.rel (!%p597_p2) target bundleno = 216 (0xd8), region = 151 }
 0x1be   : >> { %v1370_v55 = vsel %vm1368_vm3, %v1367_v52, %v1369_v53 }
 0x1bf   : >> { %v1371_v56 = vpack.c.bf16 %v1370_v55, %v1370_v55 }
 0x1c1   : >> { %1374 = vst [vmem:[%s1373_s12] sm:$0xf] %v1371_v56  ;;  %s2152_s12 = scalar_lea.hbm (%p597_p2), %s2493_s6, 64 }
 0x1c2   : > { %p2154_p9 = scmp.lt.s32.totalorder %s2152_s12, %s2148_s27 }
 0x1c4   : > { %p2155_p10 = por %p2154_p9, %p2153_p7 }
 0x1c6   : > { %p2156_p11 = pnand %p2155_p10, %p2151_p6 }
 0x1c8   : > { %2159 = shalt.err (!%p2156_p11)
}
 0x1c9   : > { %s2236_s18 = smov 64   ;;  %s2237_s19 = smov 4  }
 0x1ca   : > { %2017 = dma.vmem_to_hbm [thread:$0]  (%p2313_p4), %s1390_s15, 512, %s1392_s16, %s1376_s17, %s2236_s18, %s2236_s18, %s2237_s19  }
 0x1cb PF: > { %p2029_p12 = scmp.ge.s32.totalorder %s2222_s26, 2  ;;  %s1406_s11 = sand.u32 1, %s2202_s21  }
 0x1cc   : > { %s1407_s13 = scalar_lea.sflag [#allocation5], %s1406_s11 }
 0x1cd   : > { %p2024_p13 = pnand %p2029_p12, %p2320_p8 }
 0x1cf   : > { %p2025_p0 = pneg %p2024_p13 }
 0x1d1   : > { %2197 = dma.done.wait (%p2025_p0), %s1407_s13, 512  }
 0x1d2   : > { %2199 = vsyncadd (%p2025_p0), %s1407_s13, 4294966784  ;;  %s20_s26 = sadd.s32 1, %s2222_s26   ;;  %s2496_s21 = smov %s2206_s22 }
 0x1d3   : > { %p17_p1 = scmp.ge.s32.totalorder %s20_s26, 4   ;;  %s2497_s22 = smov %s2210_s23 }
 0x1d4   : > { %s2498_s23 = smov %s2326_s10  ;;  %s2499_s24 = smov %s2218_s25 }
 0x1d5   : > { %s2500_s25 = smov %s2502_s29  ;;  %19 = sbr.rel (!%p17_p1) target bundleno = 5 (0x5), region = 162 }
 0x1da   :  { %1413 = vsyncpa [#allocation4], 1 }
 0x1db   :  { %1415 = vsyncpa [#allocation4 + $0x1], 1 }
 0x1dc   :  { %1416 = vsyncpa [#allocation5], 1 }
 0x1dd   :  { %1418 = vsyncpa [#allocation5 + $0x1], 1 }

</bundles_post_ra>
